<compile_context>
chip_gen: v6e
topology: v6e:2x2x1
jax: 0.10.0
libtpu: 0.0.40
codegen_flags: <defaults>
</compile_context>

<pallas_src>
from typing import Any

import numpy as np
import jax
import jax.numpy as jnp
from jax import lax
from jax.experimental import pallas as pl
from jax.experimental.pallas import tpu as pltpu


# ------------------------------ helpers ----------------------------------- #

def _round_up(x: int, m: int) -> int:
    return (x + m - 1) // m * m


def _padded_block_bytes(rows: int, cols: int, dtype) -> int:
    """Real VMEM bytes of a (rows, cols) block after (sublane, lane) padding.

    32-bit tiles are (8, 128); sub-32-bit dtypes pack along sublanes, so the
    minimum second-minor extent grows to 16 (bf16) / 32 (int8).
    """
    itemsize = jnp.dtype(dtype).itemsize
    sub = 8 * max(1, 4 // max(itemsize, 1))
    return _round_up(rows, sub) * _round_up(cols, 128) * itemsize


def _vmem_budget_bytes() -> int:
    """Generation-aware VMEM budget: ~half physical, capped at 48 MiB (< v7x's
    64 MiB per-TC), floored at 16 MiB (v5e default scoped limit)."""
    cap = 64 * 1024 * 1024
    try:
        cap = int(pltpu.get_tpu_info().vmem_capacity_bytes)
    except Exception:
        pass
    return min(max(cap // 2, 16 * 1024 * 1024), 48 * 1024 * 1024)


def _pick_tile_m(M: int, footprint_fn, budget_bytes: int,
                 max_tile: int = 2048) -> int:
    """Largest power-of-two row tile whose padded double-buffered footprint
    fits the budget; clamped so grid_m >= 2 whenever M > 8 (v7x megacore)."""
    tile = max_tile
    while tile > 8 and footprint_fn(tile) > budget_bytes:
        tile //= 2
    tile = max(tile, 8)
    tile = min(tile, _round_up(M, 8))
    if M > 8 and pl.cdiv(M, tile) < 2:
        tile = max(8, _round_up(pl.cdiv(M, 2), 8))
    return tile


# ----------------------------- Pallas kernel ------------------------------ #

def _make_fused_linear_kernel(n_inputs: int, compute_dtype):
    """y = sum_i x_i @ w_i + b (concat fused into per-input MXU matmuls)."""

    def kernel(*refs):
        x_refs = refs[:n_inputs]
        w_refs = refs[n_inputs:2 * n_inputs]
        b_ref = refs[2 * n_inputs]
        o_ref = refs[2 * n_inputs + 1]

        acc = jnp.dot(x_refs[0][...].astype(compute_dtype),
                      w_refs[0][...].astype(compute_dtype),
                      preferred_element_type=jnp.float32)
        for i in range(1, n_inputs):
            acc += jnp.dot(x_refs[i][...].astype(compute_dtype),
                           w_refs[i][...].astype(compute_dtype),
                           preferred_element_type=jnp.float32)
        # Bias add in f32 on the VPU (v5e has no bf16 VALU); bias block is
        # (8, E_pad), use row 0 and let broadcasting cover the sublanes.
        o_ref[...] = (acc + b_ref[0:1, :]).astype(o_ref.dtype)

    return kernel


def pallas_fused_linear(xs2d, w_slices, bias_tile, *,
                        out_dtype=jnp.bfloat16, compute_dtype=jnp.bfloat16):
    """Fused `concat(xs2d, -1) @ concat(w_slices, 0) + bias` on TPU.

    xs2d:      list of (M, K_i) activation slabs (feature dim on lanes).
    w_slices:  list of (K_i, E_pad) weight slices (E_pad % 128 == 0).
    bias_tile: (8, E_pad) f32 bias (grid-invariant block, DMA'd once).
    Returns (M, E_pad) in out_dtype.
    """
    n = len(xs2d)
    assert n == len(w_slices) and n >= 1
    M = int(xs2d[0].shape[0])
    E_pad = int(w_slices[0].shape[1])
    assert E_pad % 128 == 0
    assert bias_tile.shape == (8, E_pad)
    for x, w in zip(xs2d, w_slices):
        assert x.shape[0] == M and x.shape[1] == w.shape[0] and w.shape[1] == E_pad

    # --- padding-aware double-buffered VMEM footprint for a given tile_m ----
    def footprint(tile_m: int) -> int:
        total = 0
        for x in xs2d:                                   # pipelined inputs
            total += 2 * _padded_block_bytes(tile_m, int(x.shape[1]), x.dtype)
        total += 2 * _padded_block_bytes(tile_m, E_pad, out_dtype)   # output
        for w in w_slices:                               # resident weights
            total += 2 * _padded_block_bytes(int(w.shape[0]), E_pad, w.dtype)
        total += 2 * _padded_block_bytes(8, E_pad, jnp.float32)      # bias
        return total

    budget = _vmem_budget_bytes()
    tile_m = _pick_tile_m(M, footprint, budget)
    grid_m = pl.cdiv(M, tile_m)

    in_specs = []
    for x in xs2d:
        K_i = int(x.shape[1])
        in_specs.append(pl.BlockSpec((tile_m, K_i), lambda i: (i, 0)))
    for w in w_slices:
        K_i = int(w.shape[0])
        # Constant index_map -> weight slice stays resident across grid steps.
        in_specs.append(pl.BlockSpec((K_i, E_pad), lambda i: (0, 0)))
    in_specs.append(pl.BlockSpec((8, E_pad), lambda i: (0, 0)))
    out_spec = pl.BlockSpec((tile_m, E_pad), lambda i: (i, 0))

    K_total = sum(int(x.shape[1]) for x in xs2d)
    out_itemsize = jnp.dtype(out_dtype).itemsize
    bytes_accessed = (
        sum(int(x.size) * x.dtype.itemsize for x in xs2d)
        + sum(int(w.size) * w.dtype.itemsize for w in w_slices)
        + int(bias_tile.size) * 4
        + M * E_pad * out_itemsize)
    cost = pl.CostEstimate(flops=2 * M * K_total * E_pad,
                           transcendentals=0,
                           bytes_accessed=bytes_accessed)

    return pl.pallas_call(
        _make_fused_linear_kernel(n, compute_dtype),
        out_shape=jax.ShapeDtypeStruct((M, E_pad), out_dtype),
        grid_spec=pl.GridSpec(
            grid=(grid_m,),
            in_specs=in_specs,
            out_specs=out_spec,
        ),
        compiler_params=pltpu.CompilerParams(
            dimension_semantics=("parallel",),   # M rows independent
            vmem_limit_bytes=budget,             # always set; <= 48 MiB (< v7x 64 MiB)
        ),
        cost_estimate=cost,
    )(*xs2d, *w_slices, bias_tile)


# ------------------------- SeqEncStep (JAX port) -------------------------- #

class SeqEncStep:
    """JAX port of the abstract sequential encoder step wrapper."""

    def __init__(self, in_keys: tuple[str, ...] = ("main",),
                 out_keys: tuple[str, ...] = ("main",)):
        self.in_keys = in_keys
        self.out_keys = out_keys

    # Base class defines all three hooks (so hasattr(self, "_fit") is True,
    # exactly as in the torch version — the _fit/_transform branch is taken).
    def _forward(self, *x: jax.Array, **kwargs: Any) -> tuple[jax.Array, ...]:
        raise NotImplementedError()

    def _fit(self, *x: jax.Array, single_eval_pos: int | None = None,
             **kwargs: Any) -> None:
        raise NotImplementedError

    def _transform(self, *x: jax.Array, single_eval_pos: int | None = None,
                   **kwargs: Any) -> tuple[jax.Array, ...]:
        raise NotImplementedError

    def forward(self, state: dict, cache_trainset_representation: bool = False,
                **kwargs: Any) -> dict:
        args = [state[in_key] for in_key in self.in_keys]
        if hasattr(self, "_fit"):
            # NOTE: bare kwargs["single_eval_pos"] access and the truthiness
            # test mirror the torch original exactly (including the quirk that
            # single_eval_pos=0 skips _fit when caching).
            if kwargs["single_eval_pos"] or not cache_trainset_representation:
                self._fit(*args, **kwargs)
            out = self._transform(*args, **kwargs)
        else:
            assert not cache_trainset_representation
            out = self._forward(*args, **kwargs)
        assert isinstance(out, tuple)
        assert len(out) == len(self.out_keys)
        state.update({out_key: out[i] for i, out_key in enumerate(self.out_keys)})
        return state


class LinearInputEncoderStep(SeqEncStep):
    """Concrete step: (fused) concat inputs on the feature dim + Linear layer.

    The Linear layer plus the concat run inside the Pallas kernel above.
    """

    def __init__(self, num_features: int, emsize: int,
                 in_keys: tuple[str, ...] = ("main",),
                 out_keys: tuple[str, ...] = ("output",),
                 seed: int = 0,
                 compute_dtype=jnp.bfloat16,
                 out_dtype=jnp.bfloat16):
        super().__init__(in_keys, out_keys)
        self.num_features = num_features
        self.emsize = emsize
        self.e_pad = _round_up(emsize, 128)          # lane-dense output stores
        self.compute_dtype = compute_dtype
        self.out_dtype = out_dtype                   # bf16 halves output HBM bytes

        # Deterministic parameter init mirroring torch.nn.Linear defaults:
        # U(-1/sqrt(fan_in), 1/sqrt(fan_in)) for both weight and bias.
        key = jax.random.PRNGKey(seed)
        kw, kb = jax.random.split(key)
        bound = 1.0 / np.sqrt(num_features)
        # torch Linear weight is (out, in); store transposed (in, out), padded
        # on the output dim to a multiple of 128 with zeros, in compute_dtype
        # (bf16 halves weight HBM bytes; MXU runs at bf16 peak on v6e/v7x).
        w_real = jax.random.uniform(kw, (num_features, emsize),
                                    dtype=jnp.float32,
                                    minval=-bound, maxval=bound)
        pad_cols = self.e_pad - emsize
        if pad_cols:
            w_real = jnp.pad(w_real, ((0, 0), (0, pad_cols)))
        self.weight_t = w_real.astype(compute_dtype)            # (F, E_pad)
        b_real = jax.random.uniform(kb, (emsize,), dtype=jnp.float32,
                                    minval=-bound, maxval=bound)
        if pad_cols:
            b_real = jnp.pad(b_real, (0, pad_cols))
        self.bias = b_real                                       # (E_pad,) f32
        # Grid-invariant (8, E_pad) bias block, materialized once here.
        self.bias_tile = jnp.asarray(
            jnp.broadcast_to(b_real.reshape(1, self.e_pad), (8, self.e_pad)))

    def _fit(self, *x: jax.Array, single_eval_pos: int | None = None,
             **kwargs: Any) -> None:
        # Stateless step: nothing depends on the train set.
        pass

    def _transform(self, *x: jax.Array, single_eval_pos: int | None = None,
                   **kwargs: Any) -> tuple[jax.Array, ...]:
        feat_sizes = [int(xi.shape[-1]) for xi in x]
        S, B = int(x[0].shape[0]), int(x[0].shape[1])
        assert sum(feat_sizes) == self.num_features
        xs = [xi.reshape(S * B, fi) for xi, fi in zip(x, feat_sizes)]

        if len(xs) > 1 and min(feat_sizes) >= 128:
            # Wide features: fuse the concat as one MXU operand per input
            # (no (M, K_total) slab materialized in HBM).
            xs2d = xs
            w_slices = []
            off = 0
            for fi in feat_sizes:
                w_slices.append(
                    lax.slice_in_dim(self.weight_t, off, off + fi, axis=0))
                off += fi
        else:
            # Narrow features (K_i << 128): one dense (M, K_total) operand
            # gives one dense DMA stream and one MXU weight push per tile;
            # the extra concat bytes are tiny next to the E_pad-wide output.
            xs2d = [xs[0] if len(xs) == 1 else jnp.concatenate(xs, axis=-1)]
            w_slices = [self.weight_t]

        y2d = pallas_fused_linear(xs2d, w_slices, self.bias_tile,
                                  out_dtype=self.out_dtype,
                                  compute_dtype=self.compute_dtype)
        if self.e_pad != self.emsize:
            # TODO(synk): carry E_pad through to the downstream consumer to
            # avoid this full read+write unpad copy when emsize % 128 != 0.
            y2d = y2d[:, :self.emsize]
        return (y2d.reshape(S, B, self.emsize),)


# --------------------------------- main ----------------------------------- #

if __name__ == "__main__":
    SEQ, BATCH = 8, 2
    F_MAIN, F_IND = 4, 4
    EMSIZE = 128                                    # lane-dense output (E % 128 == 0)

    key = jax.random.PRNGKey(0)
    k1, k2 = jax.random.split(key)
    x_main = jax.random.normal(k1, (SEQ, BATCH, F_MAIN), dtype=jnp.float32)
    x_ind = (jax.random.uniform(k2, (SEQ, BATCH, F_IND)) > 0.5).astype(jnp.float32)

    step = LinearInputEncoderStep(num_features=F_MAIN + F_IND, emsize=EMSIZE,
                                  in_keys=("main", "nan_indicators"),
                                  out_keys=("output",))
    state = {"main": x_main, "nan_indicators": x_ind}
    state = step.forward(state, cache_trainset_representation=False,
                         single_eval_pos=4)

    out = state["output"]
    jax.block_until_ready(out)
    assert out.shape == (SEQ, BATCH, EMSIZE), out.shape
    assert out.dtype == jnp.bfloat16, out.dtype

    # Cross-check the fused Pallas linear against plain JAX (f32 reference;
    # bf16 matmul operands + bf16 output in the kernel -> loose tolerance).
    xcat = jnp.concatenate([x_main, x_ind], axis=-1).reshape(SEQ * BATCH,
                                                             F_MAIN + F_IND)
    w_f32 = step.weight_t.astype(jnp.float32)[:, :EMSIZE]
    ref = xcat @ w_f32 + step.bias[:EMSIZE]
    got = np.asarray(out.astype(jnp.float32)).reshape(SEQ * BATCH, EMSIZE)
    np.testing.assert_allclose(got, np.asarray(ref), rtol=2e-2, atol=2e-2)

    print("KERNEL_OK")
</pallas_src>

<mosaic_0001>
module attributes {stable_mosaic.version = 11 : i64} {
  func.func @kernel(%arg0: i32, %arg1: memref<8x8xf32, #tpu.memory_space<vmem>>, %arg2: memref<8x128xbf16, #tpu.memory_space<vmem>>, %arg3: memref<8x128xf32, #tpu.memory_space<vmem>>, %arg4: memref<8x128xbf16, #tpu.memory_space<vmem>>) attributes {dimension_semantics = [#tpu.dimension_semantics<parallel>], iteration_bounds = array<i64: 2>, scalar_prefetch = 0 : i64, scratch_operands = 0 : i64, tpu.core_type = #tpu.core_type<tc>, window_params = [{transform_indices = @transform_0, window_bounds = array<i64: 8, 8>}, {pipeline_mode = #tpu.pipeline_mode<synchronous>, transform_indices = @transform_1, window_bounds = array<i64: 8, 128>}, {pipeline_mode = #tpu.pipeline_mode<synchronous>, transform_indices = @transform_2, window_bounds = array<i64: 8, 128>}, {transform_indices = @transform_3, window_bounds = array<i64: 8, 128>}]} {
    %c0 = arith.constant 0 : index
    %c0_0 = arith.constant 0 : index
    %0 = vector.load %arg1[%c0, %c0_0] : memref<8x8xf32, #tpu.memory_space<vmem>>, vector<8x8xf32>
    %1 = arith.truncf %0 : vector<8x8xf32> to vector<8x8xbf16>
    %c0_1 = arith.constant 0 : index
    %c0_2 = arith.constant 0 : index
    %2 = vector.load %arg2[%c0_1, %c0_2] : memref<8x128xbf16, #tpu.memory_space<vmem>>, vector<8x128xbf16>
    %cst = arith.constant dense<0.000000e+00> : vector<8x128xf32>
    %3 = tpu.matmul %1, %2, %cst {dimension_numbers = #tpu.dot_dimension_numbers<[1], [0], [0], [1], [0, 0, 1, 1], [], []>} : vector<8x8xbf16>, vector<8x128xbf16>, vector<8x128xf32> -> vector<8x128xf32>
    %c0_3 = arith.constant 0 : index
    %c0_4 = arith.constant 0 : index
    %4 = vector.load %arg3[%c0_3, %c0_4] : memref<8x128xf32, #tpu.memory_space<vmem>>, vector<1x128xf32>
    %5 = vector.broadcast %4 : vector<1x128xf32> to vector<8x128xf32>
    %6 = arith.addf %3, %5 : vector<8x128xf32>
    %7 = arith.truncf %6 : vector<8x128xf32> to vector<8x128xbf16>
    %c0_5 = arith.constant 0 : index
    %c0_6 = arith.constant 0 : index
    %8 = vector.load %arg4[%c0_5, %c0_6] : memref<8x128xbf16, #tpu.memory_space<vmem>>, vector<8x128xbf16>
    tpu.vector_store %arg4[%c0_5, %c0_6], %7 {strides = array<i32>} : memref<8x128xbf16, #tpu.memory_space<vmem>>, vector<8x128xbf16>,
    return
  }
  func.func @transform_0(%arg0: i32) -> (i32, i32) {
    %c0_i32 = arith.constant 0 : i32
    %c0_i32_0 = arith.constant 0 : i32
    return %arg0, %c0_i32 : i32, i32
  }
  func.func @transform_1(%arg0: i32) -> (i32, i32) {
    %c0_i32 = arith.constant 0 : i32
    %c0_i32_0 = arith.constant 0 : i32
    %c0_i32_1 = arith.constant 0 : i32
    return %c0_i32, %c0_i32_0 : i32, i32
  }
  func.func @transform_2(%arg0: i32) -> (i32, i32) {
    %c0_i32 = arith.constant 0 : i32
    %c0_i32_0 = arith.constant 0 : i32
    %c0_i32_1 = arith.constant 0 : i32
    return %c0_i32, %c0_i32_0 : i32, i32
  }
  func.func @transform_3(%arg0: i32) -> (i32, i32) {
    %c0_i32 = arith.constant 0 : i32
    %c0_i32_0 = arith.constant 0 : i32
    return %arg0, %c0_i32 : i32, i32
  }
}

</mosaic_0001>

<bundles_post_ra>
// kernel: tpu_custom_call.1
= control target key start
LH: loop header
LB: loop body
LE: loop exit
PB: predicated region body
PF: predicated region fallthrough
CT: control target
= control target key end

     0   :  { %8 = vsyncpa [#allocation3], 0  ;;  %s549_s0 = inlined_call_operand.vmem [shape: f32[16,8], index: 0, kind: input, shape index: {}]   ;;  %s550_s1 = inlined_call_operand.vmem [shape: bf16[8,128], index: 1, kind: input, shape index: {}]   ;;  %s551_s2 = inlined_call_operand.vmem [shape: f32[8,128], index: 2, kind: input, shape index: {}]   ;;  %s552_s3 = inlined_call_operand.hbm [shape: bf16[16,128], index: 3, kind: output, shape index: {}]  }
   0x1   :  { %10 = vsyncpa [#allocation3 + $0x1], 0  ;;  %s444_s12 = smov 0   ;;  %s446_s13 = smov 0  }
   0x2   :  { %s448_s14 = smov 0   ;;  %s450_s15 = smov 0  }
   0x3 LB: > { %s465_s16 = sadd.s32 4294967295, %s419_s15   ;;  %s298_s17 = sadd.s32 4294967294, %s419_s15   ;;  %s419_s15 = sphi %s450_s15, %s558_s15   ;;  %s415_s14 = sphi %s448_s14, %s557_s14   ;;  %s411_s13 = sphi %s446_s13, %s556_s13   ;;  %s407_s12 = sphi %s444_s12, %s555_s12  }
   0x4   : > { %s469_s18 = sadd.s32 1, %s419_s15   ;;  %s91_s19 = sadd.s32 1, %s415_s14 }
   0x5   : > { %s88_s20 = ssub.s32 %s419_s15, %s469_s18  ;;  %p101_p0 = scmp.ne.s32.totalorder %s415_s14, %s411_s13 }
   0x6   : > { %p89_p1 = scmp.eq.s32.totalorder %s88_s20, 0  ;;  %p102_p2 = scmp.eq.s32.totalorder %s465_s16, 1 }
   0x7   : > { %p107_p3 = scmp.ne.s32.totalorder %s411_s13, %s407_s12  ;;  %p108_p4 = scmp.eq.s32.totalorder %s298_s17, 1 }
   0x8   : > { %s480_s21 = scalar_select %p89_p1, %s415_s14, %s91_s19  }
   0x9   : > { %p482_p5 = por %p102_p2, %p101_p0  ;;  %p486_p6 = por %p108_p4, %p107_p3 }
   0xa   : > { %p301_p7 = scmp.ge.s32.totalorder %s419_s15, 1  ;;  %p139_p8 = scmp.lt.s32.totalorder %s419_s15, 3 }
   0xc   : > { %p140_p9 = pnand %p301_p7, %p139_p8 }
   0xd   : > { %p162_p10 = scmp.lt.s32.totalorder (!%p140_p9), %s465_s16, 1  ;;  %s159_s4 = sand.u32 (!%p140_p9), 1, %s411_s13  }
   0xe   : > { %143 = sbr.rel (%p140_p9) target bundleno = 237 (0xed), region = 32  ;;  %s302_s5 = sshll.u32 (!%p140_p9), %s159_s4, 2 }
   0xf   : > { %s307_s8 = sshll.u32 (!%p140_p9), %s465_s16, 6  ;;  %s161_s9 = scalar_lea.vmem (!%p140_p9), [#allocation2], %s302_s5 }
  0x10   : > { %s239_s10 = sshll.u32 (!%p140_p9), %s161_s9, 4  ;;  %s508_s19 = scalar_lea.hbm (!%p140_p9), %s552_s3, %s307_s8  ;;  %s510_s10 = int_to_ptr.vmem [resolvable:$true] %s239_s10 }
  0x11   : > { %s226_s20 = scalar_lea.sflag (!%p140_p9), [#allocation3], %s159_s4  ;;  %s423_s24 = smov (!%p140_p9), [#allocation2]  }
  0x12   : > { %s363_s25 = sshll.u32 (!%p140_p9), %s423_s24, 4  ;;  %s364_s25 = int_to_ptr.vmem [resolvable:$false] %s363_s25 }
  0x13   : > { %v169_v0 = vld [vmem:[%s550_s1] sm:$0xf]  ;;  %vm179_vm0 = vcmask 1043456   ;;  %v421_v1 = vmov 0.0   ;;  %vm422_vm1 = vmmov 0   ;;  %s163_s26 = scalar_select %p162_p10, %s465_s16, 1 }
  0x14   : > { %312 = vmatprep.subr.bf16.mxu0 %v421_v1  ;;  %v181_v2 = vsel %vm179_vm0, %v169_v0, 0  ;;  %314 = vmatprep.mubr.msk.bf16.mxu0 %vm422_vm1, %v421_v1  ;;  %vm175_vm2 = vcmask 64512   ;;  %v304_v5 = vld [vmem:[%s551_s2] ss:$0 sm:$0xff]  ;;  %s359_s16 = scalar_lea.vmem %s510_s10, 64  ;;  %p366_p0 = scmp.lt.s32.totalorder %s510_s10, %s364_s25 }
  0x15   : > { %313 = vmatpush3.bf16.msra.mxu0 %v181_v2  ;;  %s303_s27 = sshll.u32 %s163_s26, 3  ;;  %p360_p11 = scmp.ne.s32.totalorder %s510_s10, %s359_s16 }
  0x16   : > { %s165_s30 = scalar_lea.vmem %s549_s0, %s303_s27  ;;  %s365_s26 = scalar_lea.vmem %s364_s25, 128 }
  0x17   : > { %v167_v3 = vld [vmem:[%s165_s30] sm:$0xff]  ;;  %p361_p12 = pnand %p360_p11, %p482_p5  ;;  %p367_p1 = scmp.lt.s32.totalorder %s365_s26, %s359_s16 }
  0x18   : > { %v168_v4 = vpack.c.bf16 %v167_v3, %v167_v3 }
  0x19   : > { %p362_p13 = pneg %p361_p12  ;;  %p368_p2 = por %p367_p1, %p366_p0 }
  0x1a   : > { %315 = vmatmul.mubr.msk.bf16.vlgmr.msra.gmra.mxu0 %vm175_vm2, %v168_v4 }
  0x1b   : > { %p369_p3 = pnand %p368_p2, %p362_p13 }
  0xda   : > { %v217_v6 = vpop.f32.mrf.mxu0 }
  0xdb   : > { %v218_v7 = vadd.f32 %v304_v5, %v217_v6 }
  0xdc   : > { %v316_v8 = vpop.f32.mrf.mxu0 }
  0xdd   : > { %v223_v9 = vpack.c.bf16 %v218_v7, %v218_v7 }
  0xde   : > { %v220_v10 = vpop.f32.mrf.mxu0 }
  0xdf   : > { %224 = vst [vmem:[%s161_s9] sm:$0xf] %v223_v9 }
  0xe0   : > { %v317_v11 = vpop.f32.mrf.mxu0 }
  0xe1   : > { %372 = shalt.err (!%p369_p3)
}
  0xe2   : > { %s373_s27 = scalar_lea.hbm %s508_s19, 64  ;;  %s377_s30 = scalar_lea.hbm %s552_s3, 128 }
  0xe3   : > { %p374_p4 = scmp.ne.s32.totalorder %s508_s19, %s373_s27  ;;  %p378_p9 = scmp.lt.s32.totalorder %s508_s19, %s552_s3 }
  0xe4   : > { %p379_p10 = scmp.lt.s32.totalorder %s377_s30, %s373_s27 }
  0xe5   : > { %p375_p7 = pnand %p374_p4, %p482_p5 }
  0xe6   : > { %p380_p11 = por %p379_p10, %p378_p9 }
  0xe7   : > { %p376_p8 = pneg %p375_p7 }
  0xe9   : > { %p381_p12 = pnand %p380_p11, %p376_p8 }
  0xeb   : > { %384 = shalt.err (!%p381_p12)
}
  0xec   : > { %318 = dma.vmem_to_hbm [thread:$0]  (%p482_p5), %s510_s10, 64, %s508_s19, %s226_s20  }
  0xed PF: > { %p324_p13 = scmp.ge.s32.totalorder %s419_s15, 2  ;;  %s251_s6 = sand.u32 1, %s407_s12  }
  0xee   : > { %s252_s7 = scalar_lea.sflag [#allocation3], %s251_s6 }
  0xef   : > { %p321_p0 = pnand %p324_p13, %p486_p6 }
  0xf1   : > { %p322_p1 = pneg %p321_p0 }
  0xf3   : > { %402 = dma.done.wait (%p322_p1), %s252_s7, 64  }
  0xf4   : > { %404 = vsyncadd (%p322_p1), %s252_s7, 4294967232  ;;  %p13_p2 = scmp.ge.s32.totalorder %s469_s18, 4   ;;  %s555_s12 = smov %s411_s13 }
  0xf5   : > { %s556_s13 = smov %s415_s14  ;;  %s557_s14 = smov %s480_s21 }
  0xf6   : > { %s558_s15 = smov %s469_s18  ;;  %15 = sbr.rel (!%p13_p2) target bundleno = 3 (0x3), region = 67 }
  0xfb   :  { %257 = vsyncpa [#allocation3], 1 }
  0xfc   :  { %259 = vsyncpa [#allocation3 + $0x1], 1 }

</bundles_post_ra>
